<compile_context>
chip_gen: v7x
topology: tpu7x:2x2x1
jax: 0.10.0
libtpu: 0.0.40
codegen_flags: <defaults>
</compile_context>

<pallas_src>
import functools
import numpy as np
import jax
import jax.numpy as jnp
from jax.experimental import pallas as pl
from jax.experimental.pallas import tpu as pltpu

N = 8  # DCT block size

YCBCR = np.array([[0.299, 0.587, 0.114],
                  [-0.169, -0.331, 0.5],
                  [0.5, -0.419, -0.081]], dtype=np.float32)


def make_dct_basis(n=8):
    """dct_weight[k, i, j] exactly as DCT.rearrange (no zigzag)."""
    w = np.zeros((n * n, n, n), dtype=np.float64)
    for k in range(n * n):
        u, v = k // n, k % n
        cu = np.sqrt(1.0 / n) if u == 0 else np.sqrt(2.0 / n)
        cv = np.sqrt(1.0 / n) if v == 0 else np.sqrt(2.0 / n)
        for i in range(n):
            for j in range(n):
                w[k, i, j] = (np.cos(np.pi * u * (i + 0.5) / n)
                              * np.cos(np.pi * v * (j + 0.5) / n) * cu * cv)
    return w.astype(np.float32)


def _dct_norm_kernel(x_ref, w_ref, max_ref, min_ref, o_ref, *, num_norm_iters):
    # x_ref:   (1, CF, TP)  channel-major patch tile of one batch element
    # w_ref:   (CF, CF)     combined weight, row = out channel, col = in feature
    # max_ref: (1, CF, 1)   per-(batch, out-channel) max
    # min_ref: (1, CF, 1)   per-(batch, out-channel) min
    # o_ref:   (1, CF, TP)
    x = x_ref[0]                                                   # (CF, TP)
    w = w_ref[...]                                                 # (CF, CF)
    y = jnp.dot(w, x, preferred_element_type=jnp.float32)          # (CF, TP) -- MXU hot path

    m = max_ref[0]                                                 # (CF, 1)
    s = min_ref[0]                                                 # (CF, 1)
    r = 1.0 / (m - s + 1e-6)                                       # per-channel reciprocal (tiny)

    # The PyTorch module applies (t - s) / denom  B(=batch) times in-place.  Collapse the
    # B passes over the big tile into one fused scale+bias; the recurrence below runs only
    # on the tiny (CF, 1) vectors so it is free.
    scale = jnp.ones_like(r)
    bias = jnp.zeros_like(r)
    for _ in range(num_norm_iters):
        bias = (bias - s) * r
        scale = scale * r

    o_ref[0] = (y * scale + bias).astype(o_ref.dtype)


def _pick_patch_tile(P):
    """Pick the patch-dimension tile: full P if small, else a multiple of 128 capped by VMEM."""
    try:
        vmem_bytes = pltpu.get_tpu_info().vmem_capacity_bytes
    except Exception:
        vmem_bytes = 64 * 1024 * 1024
    # v7x has 64 MiB VMEM per TC -> use smaller tiles; v5e/v6e (128 MiB) can go bigger.
    tp_cap = 1024 if vmem_bytes <= 64 * 1024 * 1024 else 2048
    if P <= tp_cap:
        return P          # single tile: block == full dim, no 128-divisibility requirement
    return tp_cap         # multiple of 128


def dct_forward(x, max_, min_, *, n=N):
    """x: (B, 3, H, W) float32 NCHW; max_, min_: (B, 3*n*n, 1, 1).
    Returns (B, 3*n*n, H//n, W//n) matching DCT.forward."""
    B, C, H, W = x.shape
    assert C == 3 and H % n == 0 and W % n == 0
    Hb, Wb = H // n, W // n
    P = Hb * Wb
    F = n * n
    CF = C * F

    # Combined weight (out, in): out channel d*64+k = DCT basis k of YCbCr channel d;
    # in feature c*64+p = pixel p (= i*8+j) of RGB channel c.
    #   Wio[d*64+k, c*64+p] = YCBCR[d, c] * Wdct[k, p]
    Wdct = make_dct_basis(n).reshape(F, F)                               # (basis, pixel)
    Wio = np.einsum('dc,kp->dkcp', YCBCR, Wdct).reshape(CF, CF)
    Wio = jnp.asarray(Wio.astype(np.float32))

    # NCHW -> channel-major patch layout (B, C*64, P); feature ordering c*64 + i*8 + j,
    # patch ordering hb*Wb + wb.  (Single XLA transpose on the input side; the output
    # needs no transpose at all.)
    xp = x.reshape(B, C, Hb, n, Wb, n).transpose(0, 1, 3, 5, 2, 4).reshape(B, CF, P)
    mx = max_.reshape(B, CF, 1)
    mn = min_.reshape(B, CF, 1)

    TP = _pick_patch_tile(P)
    P_pad = ((P + TP - 1) // TP) * TP
    if P_pad != P:
        xp = jnp.pad(xp, ((0, 0), (0, 0), (0, P_pad - P)))
    nP = P_pad // TP

    kernel = functools.partial(_dct_norm_kernel, num_norm_iters=B)

    cost = pl.CostEstimate(
        flops=2 * B * P_pad * CF * CF,
        transcendentals=0,
        bytes_accessed=4 * (2 * B * P_pad * CF + CF * CF + 4 * B * CF),
    )

    out = pl.pallas_call(
        kernel,
        out_shape=jax.ShapeDtypeStruct((B, CF, P_pad), jnp.float32),
        grid=(B, nP),
        in_specs=[
            pl.BlockSpec((1, CF, TP), lambda b, p: (b, 0, p)),
            pl.BlockSpec((CF, CF), lambda b, p: (0, 0)),        # VMEM-resident weight
            pl.BlockSpec((1, CF, 1), lambda b, p: (b, 0, 0)),
            pl.BlockSpec((1, CF, 1), lambda b, p: (b, 0, 0)),
        ],
        out_specs=pl.BlockSpec((1, CF, TP), lambda b, p: (b, 0, p)),
        compiler_params=pltpu.CompilerParams(
            dimension_semantics=("parallel", "parallel")),
        cost_estimate=cost,
    )(xp, Wio, mx, mn)

    # Channel-major (B, CF, P) -> NCHW (B, CF, Hb, Wb): just a reshape (free).
    if P_pad != P:
        out = out[:, :, :P]
    return out.reshape(B, CF, Hb, Wb)


def dct_forward_ref(x, max_, min_, n=N):
    """Pure-JAX reference mirroring the PyTorch module."""
    B, C, H, W = x.shape
    T = jnp.asarray(YCBCR)
    ycbcr = jnp.einsum('dc,bchw->bdhw', T, x)                      # 1x1 conv
    Wdct = jnp.asarray(make_dct_basis(n))
    yb = ycbcr.reshape(B, C, H // n, n, W // n, n)
    dct = jnp.einsum('kij,bchiwj->bckhw', Wdct, yb).reshape(B, C * n * n, H // n, W // n)
    out = dct
    for _ in range(B):  # the module's (buggy but faithful) repeated normalization
        out = (out - min_) / (max_ - min_ + 1e-6)
    return out


if __name__ == "__main__":
    key = jax.random.PRNGKey(0)
    k1, k2, k3 = jax.random.split(key, 3)
    B, C, H, W = 2, 3, 16, 16
    x = jax.random.uniform(k1, (B, C, H, W), dtype=jnp.float32)                      # RGB in [0,1]
    max_ = jax.random.uniform(k2, (B, C * N * N, 1, 1), dtype=jnp.float32,
                              minval=1.0, maxval=2.0)
    min_ = jax.random.uniform(k3, (B, C * N * N, 1, 1), dtype=jnp.float32,
                              minval=-1.0, maxval=0.0)

    out = dct_forward(x, max_, min_)
    jax.block_until_ready(out)

    ref = dct_forward_ref(x, max_, min_)
    np.testing.assert_allclose(np.asarray(out), np.asarray(ref), rtol=1e-4, atol=1e-4)
    print("KERNEL_OK")
</pallas_src>

<mosaic_0001>
module attributes {stable_mosaic.version = 11 : i64} {
  func.func @_dct_norm_kernel(%arg0: i32, %arg1: i32, %arg2: memref<1x192x4xf32, #tpu.memory_space<vmem>>, %arg3: memref<192x192xf32, #tpu.memory_space<vmem>>, %arg4: memref<1x192x1xf32, #tpu.memory_space<vmem>>, %arg5: memref<1x192x1xf32, #tpu.memory_space<vmem>>, %arg6: memref<1x192x4xf32, #tpu.memory_space<vmem>>) attributes {dimension_semantics = [#tpu.dimension_semantics<parallel>, #tpu.dimension_semantics<parallel>], iteration_bounds = array<i64: 2, 1>, scalar_prefetch = 0 : i64, scratch_operands = 0 : i64, tpu.core_type = #tpu.core_type<tc>, window_params = [{transform_indices = @transform_0, window_bounds = array<i64: 1, 192, 4>}, {pipeline_mode = #tpu.pipeline_mode<synchronous>, transform_indices = @transform_1, window_bounds = array<i64: 192, 192>}, {transform_indices = @transform_2, window_bounds = array<i64: 1, 192, 1>}, {transform_indices = @transform_3, window_bounds = array<i64: 1, 192, 1>}, {transform_indices = @transform_4, window_bounds = array<i64: 1, 192, 4>}]} {
    %c0 = arith.constant 0 : index
    %c0_0 = arith.constant 0 : index
    %c0_1 = arith.constant 0 : index
    %0 = vector.load %arg2[%c0, %c0_0, %c0_1] : memref<1x192x4xf32, #tpu.memory_space<vmem>>, vector<1x192x4xf32>
    %1 = vector.shape_cast %0 : vector<1x192x4xf32> to vector<192x4xf32>
    %c0_2 = arith.constant 0 : index
    %c0_3 = arith.constant 0 : index
    %2 = vector.load %arg3[%c0_2, %c0_3] : memref<192x192xf32, #tpu.memory_space<vmem>>, vector<192x192xf32>
    %cst = arith.constant dense<0.000000e+00> : vector<192x4xf32>
    %3 = tpu.matmul %2, %1, %cst {dimension_numbers = #tpu.dot_dimension_numbers<[1], [0], [0], [1], [0, 0, 1, 1], [], []>} : vector<192x192xf32>, vector<192x4xf32>, vector<192x4xf32> -> vector<192x4xf32>
    %c0_4 = arith.constant 0 : index
    %c0_5 = arith.constant 0 : index
    %c0_6 = arith.constant 0 : index
    %4 = vector.load %arg4[%c0_4, %c0_5, %c0_6] : memref<1x192x1xf32, #tpu.memory_space<vmem>>, vector<1x192x1xf32>
    %5 = vector.shape_cast %4 : vector<1x192x1xf32> to vector<192x1xf32>
    %c0_7 = arith.constant 0 : index
    %c0_8 = arith.constant 0 : index
    %c0_9 = arith.constant 0 : index
    %6 = vector.load %arg5[%c0_7, %c0_8, %c0_9] : memref<1x192x1xf32, #tpu.memory_space<vmem>>, vector<1x192x1xf32>
    %7 = vector.shape_cast %6 : vector<1x192x1xf32> to vector<192x1xf32>
    %8 = arith.subf %5, %7 : vector<192x1xf32>
    %cst_10 = arith.constant 9.99999997E-7 : f32
    %9 = vector.broadcast %cst_10 : f32 to vector<192x1xf32>
    %10 = arith.addf %8, %9 : vector<192x1xf32>
    %cst_11 = arith.constant 1.000000e+00 : f32
    %11 = vector.broadcast %cst_11 : f32 to vector<192x1xf32>
    %12 = arith.divf %11, %10 : vector<192x1xf32>
    %cst_12 = arith.constant 1.000000e+00 : f32
    %13 = vector.broadcast %cst_12 : f32 to vector<192x1xf32>
    %cst_13 = arith.constant 0.000000e+00 : f32
    %14 = vector.broadcast %cst_13 : f32 to vector<192x1xf32>
    %15 = arith.subf %14, %7 : vector<192x1xf32>
    %16 = arith.mulf %15, %12 : vector<192x1xf32>
    %17 = arith.mulf %13, %12 : vector<192x1xf32>
    %18 = arith.subf %16, %7 : vector<192x1xf32>
    %19 = arith.mulf %18, %12 : vector<192x1xf32>
    %20 = arith.mulf %17, %12 : vector<192x1xf32>
    %21 = vector.broadcast %20 : vector<192x1xf32> to vector<192x4xf32>
    %22 = arith.mulf %3, %21 : vector<192x4xf32>
    %23 = vector.broadcast %19 : vector<192x1xf32> to vector<192x4xf32>
    %24 = arith.addf %22, %23 : vector<192x4xf32>
    %c0_14 = arith.constant 0 : index
    %c0_15 = arith.constant 0 : index
    %c0_16 = arith.constant 0 : index
    %25 = vector.load %arg6[%c0_14, %c0_15, %c0_16] : memref<1x192x4xf32, #tpu.memory_space<vmem>>, vector<1x192x4xf32>
    %26 = vector.shape_cast %25 : vector<1x192x4xf32> to vector<192x4xf32>
    %27 = vector.shape_cast %24 : vector<192x4xf32> to vector<1x192x4xf32>
    tpu.vector_store %arg6[%c0_14, %c0_15, %c0_16], %27 {strides = array<i32>} : memref<1x192x4xf32, #tpu.memory_space<vmem>>, vector<1x192x4xf32>,
    return
  }
  func.func @transform_0(%arg0: i32, %arg1: i32) -> (i32, i32, i32) {
    %c0_i32 = arith.constant 0 : i32
    %c0_i32_0 = arith.constant 0 : i32
    return %arg0, %c0_i32, %arg1 : i32, i32, i32
  }
  func.func @transform_1(%arg0: i32, %arg1: i32) -> (i32, i32) {
    %c0_i32 = arith.constant 0 : i32
    %c0_i32_0 = arith.constant 0 : i32
    %c0_i32_1 = arith.constant 0 : i32
    return %c0_i32, %c0_i32_0 : i32, i32
  }
  func.func @transform_2(%arg0: i32, %arg1: i32) -> (i32, i32, i32) {
    %c0_i32 = arith.constant 0 : i32
    %c0_i32_0 = arith.constant 0 : i32
    %c0_i32_1 = arith.constant 0 : i32
    return %arg0, %c0_i32, %c0_i32_0 : i32, i32, i32
  }
  func.func @transform_3(%arg0: i32, %arg1: i32) -> (i32, i32, i32) {
    %c0_i32 = arith.constant 0 : i32
    %c0_i32_0 = arith.constant 0 : i32
    %c0_i32_1 = arith.constant 0 : i32
    return %arg0, %c0_i32, %c0_i32_0 : i32, i32, i32
  }
  func.func @transform_4(%arg0: i32, %arg1: i32) -> (i32, i32, i32) {
    %c0_i32 = arith.constant 0 : i32
    %c0_i32_0 = arith.constant 0 : i32
    return %arg0, %c0_i32, %arg1 : i32, i32, i32
  }
}

</mosaic_0001>

<bundles_post_ra>
// kernel: tpu_custom_call.1
= control target key start
LH: loop header
LB: loop body
LE: loop exit
PB: predicated region body
PF: predicated region fallthrough
CT: control target
= control target key end

     0   :  { %s1506_s15 = smov 0   ;;  %s1508_s16 = smov 0   ;;  %s2207_s0 = inlined_call_operand.vmem [shape: f32[2,192,4], index: 0, kind: input, shape index: {}]   ;;  %s2208_s1 = inlined_call_operand.vmem [shape: f32[192,192], index: 1, kind: input, shape index: {}]   ;;  %s2209_s2 = inlined_call_operand.vmem [shape: f32[2,192,1], index: 2, kind: input, shape index: {}]   ;;  %s2210_s3 = inlined_call_operand.vmem [shape: f32[2,192,1], index: 3, kind: input, shape index: {}]   ;;  %s2211_s4 = inlined_call_operand.vmem [shape: f32[2,192,4], index: 4, kind: output, shape index: {}]  }
   0x1   :  { %s1510_s17 = smov 0  }
   0x2 LB: > { %s26_s18 = sadd.s32 1, %s1473_s16  ;;  %p1287_p0 = scmp.ge.s32.totalorder %s1477_s17, 1  ;;  %s1477_s17 = sphi %s1510_s17, %s14_s17   ;;  %s1473_s16 = sphi %s1508_s16, %s2217_s16   ;;  %s1469_s15 = sphi %s1506_s15, %s2216_s15  }
   0x3   : > { %p28_p1 = scmp.ge.s32.totalorder %s26_s18, 2  ;;  %p201_p2 = scmp.lt.s32.totalorder %s1477_s17, 3 }
   0x5   : > { %s2219_s18 = smov (%p28_p1, %s26_s18), 0  ;;  %p202_p3 = pnand %p1287_p0, %p201_p2 }
   0x7   : > { %205 = sbr.rel (%p202_p3) target bundleno = 331 (0x14b), region = 36 }
   0xe   : > { %p243_p4 = scmp.lt.s32.totalorder %s1469_s15, 1  ;;  %v294_v0 = vld [vmem:[%s2208_s1 + $0x8] sm:$0xff]  ;;  %vm341_vm0 = vcmask 523264   ;;  %v1479_v2 = vmov 0.0|0.0   ;;  %v1480_v3 = vmov 0   ;;  %vm1151_vm1 = vcmask 31744  }
   0xf   : > { %v318_v1 = vld [vmem:[%s2208_s1 + $0xc8] sm:$0xff]  ;;  %1318 = vmatprep.subr.bf16.mxu0 %v1479_v2  ;;  %1354 = vmatprep.subr.bf16.mxu1 %v1479_v2 }
  0x10   : > { %s2221_s15 = smov (!%p243_p4, %s1469_s15), 1  ;;  %1406 = vset.pattern.permute.xlu1 %v1480_v3  ;;  %1405 = vset.pattern.permute.xlu0 %v1480_v3 }
  0x11   : > { %1292 = vmatprep.mubr.msk.f32.mxu0 %vm341_vm0, %v294_v0  ;;  %1304 = vmatprep.mubr.msk.f32.mxu1 %vm341_vm0, %v318_v1  ;;  %s1534_s23 = smul.u32 192, %s2221_s15 }
  0x13   : > { %s1540_s26 = scalar_lea.vmem %s2207_s0, %s1534_s23  ;;  %s1546_s29 = scalar_lea.vmem %s2209_s2, %s1534_s23 }
  0x14   : > { %s1552_s6 = scalar_lea.vmem %s2210_s3, %s1534_s23  ;;  %v269_v4 = vld [vmem:[%s1540_s26] sm:$0xff]  ;;  %v270_v5 = vld [vmem:[%s1540_s26 + $0x8] sm:$0xff]  ;;  %v271_v6 = vld [vmem:[%s1540_s26 + $0x10] sm:$0xff]  ;;  %s2124_s13 = scalar_lea.vmem %s2211_s4, %s1534_s23 }
  0x15   : > { %v1319_v7 = vpack.c.bf16 %v270_v5, %v269_v4  ;;  %v272_v8 = vld [vmem:[%s1540_s26 + $0x18] sm:$0xff]  ;;  %v601_v9 = vld [vmem:[%s1546_s29 + $0x10] sm:$0xff]  ;;  %v599_v12 = vld [vmem:[%s1546_s29] sm:$0xff] }
  0x16   : > { %v1322_v10 = vpack.c.bf16 %v272_v8, %v271_v6  ;;  %v1560_v11 = vld [vmem:[%s1552_s6 + $0x10] sm:$0xff]  ;;  %v1564_v13 = vld [vmem:[%s1552_s6] sm:$0xff]  ;;  %v274_v15 = vld [vmem:[%s1540_s26 + $0x28] sm:$0xff] }
  0x17   : > { %1320 = vmatpush1.bf16.msra.mxu0 %v1319_v7  ;;  %1366 = vmatpush1.bf16.msra.mxu1 %v1319_v7  ;;  %v273_v14 = vld [vmem:[%s1540_s26 + $0x20] sm:$0xff]  ;;  %v649_v16 = vsub.f32 %v601_v9, %v1560_v11  ;;  %v647_v17 = vsub.f32 %v599_v12, %v1564_v13  ;;  %v602_v18 = vld [vmem:[%s1546_s29 + $0x18] sm:$0xff]  ;;  %v600_v20 = vld [vmem:[%s1546_s29 + $0x8] sm:$0xff] }
  0x18   : > { %1321 = vmatprep.subr.bf16.mxu0 %v1479_v2  ;;  %1355 = vmatprep.subr.bf16.mxu1 %v1479_v2  ;;  %v1574_v19 = vld [vmem:[%s1552_s6 + $0x18] sm:$0xff]  ;;  %v1578_v21 = vld [vmem:[%s1552_s6 + $0x8] sm:$0xff]  ;;  %v275_v22 = vld [vmem:[%s1540_s26 + $0x30] sm:$0xff]  ;;  %v1325_v27 = vpack.c.bf16 %v274_v15, %v273_v14 }
  0x19   : > { %v673_v23 = vadd.f32 1e-06, %v649_v16  ;;  %v671_v24 = vadd.f32 1e-06, %v647_v17  ;;  %v650_v25 = vsub.f32 %v602_v18, %v1574_v19  ;;  %v648_v26 = vsub.f32 %v600_v20, %v1578_v21  ;;  %v604_v28 = vld [vmem:[%s1546_s29 + $0x28] sm:$0xff]  ;;  %v603_v30 = vld [vmem:[%s1546_s29 + $0x20] sm:$0xff] }
  0x1a   : > { %v1585_v29 = vld [vmem:[%s1552_s6 + $0x28] sm:$0xff]  ;;  %v276_v31 = vld [vmem:[%s1540_s26 + $0x38] sm:$0xff]  ;;  %v1593_v35 = vld [vmem:[%s1552_s6 + $0x20] sm:$0xff] }
  0x1b   : > { %1323 = vmatpush1.bf16.msra.mxu0 %v1322_v10  ;;  %1367 = vmatpush1.bf16.msra.mxu1 %v1322_v10  ;;  %1407 = vrcp.f32 %v673_v23  ;;  %v674_v32 = vadd.f32 1e-06, %v650_v25  ;;  %v672_v33 = vadd.f32 1e-06, %v648_v26  ;;  %v652_v34 = vsub.f32 %v604_v28, %v1585_v29  ;;  %v606_v37 = vld [vmem:[%s1546_s29 + $0x38] sm:$0xff]  ;;  %v605_v41 = vld [vmem:[%s1546_s29 + $0x30] sm:$0xff] }
  0x1c   : > { %1324 = vmatprep.subr.bf16.mxu0 %v1479_v2  ;;  %1356 = vmatprep.subr.bf16.mxu1 %v1479_v2  ;;  %1409 = vrcp.f32 %v671_v24  ;;  %v651_v36 = vsub.f32 %v603_v30, %v1593_v35  ;;  %v1598_v38 = vld [vmem:[%s1552_s6 + $0x38] sm:$0xff]  ;;  %v1603_v42 = vld [vmem:[%s1552_s6 + $0x30] sm:$0xff]  ;;  %v1328_v43 = vpack.c.bf16 %v276_v31, %v275_v22  ;;  %v277_v44 = vld [vmem:[%s1540_s26 + $0x40] sm:$0xff] }
  0x1d   : > { %1411 = vrcp.f32 %v674_v32  ;;  %v676_v39 = vadd.f32 1e-06, %v652_v34  ;;  %v654_v40 = vsub.f32 %v606_v37, %v1598_v38  ;;  %v653_v46 = vsub.f32 %v605_v41, %v1603_v42  ;;  %v608_v47 = vld [vmem:[%s1546_s29 + $0x48] sm:$0xff]  ;;  %v607_v52 = vld [vmem:[%s1546_s29 + $0x40] sm:$0xff]  ;;  %v610_v56 = vld [vmem:[%s1546_s29 + $0x58] sm:$0xff] }
  0x1e   : > { %1413 = vrcp.f32 %v672_v33  ;;  %v675_v45 = vadd.f32 1e-06, %v651_v36  ;;  %v1609_v48 = vld [vmem:[%s1552_s6 + $0x48] sm:$0xff]  ;;  %v1617_v53 = vld [vmem:[%s1552_s6 + $0x40] sm:$0xff]  ;;  %v1622_v57 = vld [vmem:[%s1552_s6 + $0x58] sm:$0xff] }
  0x1f   : > { %1326 = vmatpush1.bf16.msra.mxu0 %v1325_v27  ;;  %1368 = vmatpush1.bf16.msra.mxu1 %v1325_v27  ;;  %v278_v49 = vld [vmem:[%s1540_s26 + $0x48] sm:$0xff]  ;;  %1415 = vrcp.f32 %v676_v39  ;;  %v678_v50 = vadd.f32 1e-06, %v654_v40  ;;  %v656_v51 = vsub.f32 %v608_v47, %v1609_v48  ;;  %v677_v54 = vadd.f32 1e-06, %v653_v46  ;;  %v609_v58 = vld [vmem:[%s1546_s29 + $0x50] sm:$0xff] }
  0x20   : > { %1327 = vmatprep.subr.bf16.mxu0 %v1479_v2  ;;  %1357 = vmatprep.subr.bf16.mxu1 %v1479_v2  ;;  %1417 = vrcp.f32 %v675_v45  ;;  %v655_v55 = vsub.f32 %v607_v52, %v1617_v53  ;;  %v1626_v59 = vld [vmem:[%s1552_s6 + $0x50] sm:$0xff]  ;;  %v1331_v60 = vpack.c.bf16 %v278_v49, %v277_v44  ;;  %v280_v62 = vld [vmem:[%s1540_s26 + $0x58] sm:$0xff]  ;;  %v658_v0 = vsub.f32 %v610_v56, %v1622_v57  ;;  %v612_v4 = vld [vmem:[%s1546_s29 + $0x68] sm:$0xff] }
  0x21   : > { %v279_v61 = vld [vmem:[%s1540_s26 + $0x50] sm:$0xff]  ;;  %1419 = vrcp.f32 %v678_v50  ;;  %v680_v63 = vadd.f32 1e-06, %v656_v51  ;;  %v657_v3 = vsub.f32 %v609_v58, %v1626_v59  ;;  %v1636_v5 = vld [vmem:[%s1552_s6 + $0x68] sm:$0xff]  ;;  %v611_v7 = vld [vmem:[%s1546_s29 + $0x60] sm:$0xff] }
  0x22   : > { %1421 = vrcp.f32 %v677_v54  ;;  %v679_v1 = vadd.f32 1e-06, %v655_v55  ;;  %v1642_v8 = vld [vmem:[%s1552_s6 + $0x60] sm:$0xff]  ;;  %v1334_v12 = vpack.c.bf16 %v280_v62, %v279_v61  ;;  %v282_v17 = vld [vmem:[%s1540_s26 + $0x68] sm:$0xff]  ;;  %v682_v18 = vadd.f32 1e-06, %v658_v0 }
  0x23   : > { %1329 = vmatpush1.bf16.msra.mxu0 %v1328_v43  ;;  %1369 = vmatpush1.bf16.msra.mxu1 %v1328_v43  ;;  %v281_v16 = vld [vmem:[%s1540_s26 + $0x60] sm:$0xff]  ;;  %1423 = vrcp.f32 %v680_v63  ;;  %v660_v20 = vsub.f32 %v612_v4, %v1636_v5  ;;  %v681_v24 = vadd.f32 1e-06, %v657_v3  ;;  %v659_v25 = vsub.f32 %v611_v7, %v1642_v8  ;;  %v614_v26 = vld [vmem:[%s1546_s29 + $0x78] sm:$0xff]  ;;  %v613_v31 = vld [vmem:[%s1546_s29 + $0x70] sm:$0xff] }
  0x24   : > { %1330 = vmatprep.subr.bf16.mxu0 %v1479_v2  ;;  %1358 = vmatprep.subr.bf16.mxu1 %v1479_v2  ;;  %1425 = vrcp.f32 %v679_v1  ;;  %v1664_v27 = vld [vmem:[%s1552_s6 + $0x78] sm:$0xff]  ;;  %v1672_v32 = vld [vmem:[%s1552_s6 + $0x70] sm:$0xff]  ;;  %v1337_v34 = vpack.c.bf16 %v282_v17, %v281_v16  ;;  %v616_v45 = vld [vmem:[%s1546_s29 + $0x88] sm:$0xff] }
  0x25   : > { %v1638_v6 = vpop.eup %1407  ;;  %v283_v36 = vld [vmem:[%s1540_s26 + $0x70] sm:$0xff]  ;;  %v284_v37 = vld [vmem:[%s1540_s26 + $0x78] sm:$0xff]  ;;  %1427 = vrcp.f32 %v682_v18  ;;  %v684_v39 = vadd.f32 1e-06, %v660_v20  ;;  %v662_v40 = vsub.f32 %v614_v26, %v1664_v27  ;;  %v683_v43 = vadd.f32 1e-06, %v659_v25 }
  0x26   : > { %v1644_v9 = vpop.eup %1409  ;;  %v841_v10 = vmul.f32 %v1638_v6, %v1638_v6  ;;  %1429 = vrcp.f32 %v681_v24  ;;  %v661_v44 = vsub.f32 %v613_v31, %v1672_v32  ;;  %v1686_v46 = vld [vmem:[%s1552_s6 + $0x88] sm:$0xff]  ;;  %v615_v50 = vld [vmem:[%s1546_s29 + $0x80] sm:$0xff]  ;;  %v1340_v54 = vpack.c.bf16 %v284_v37, %v283_v36  ;;  %v618_v0 = vld [vmem:[%s1546_s29 + $0x98] sm:$0xff] }
  0x27   : > { %1332 = vmatpush1.bf16.msra.mxu0 %v1331_v60  ;;  %1370 = vmatpush1.bf16.msra.mxu1 %v1331_v60  ;;  %v1648_v14 = vpop.eup %1411  ;;  %v839_v15 = vmul.f32 %v1644_v9, %v1644_v9  ;;  %v1694_v51 = vld [vmem:[%s1552_s6 + $0x80] sm:$0xff]  ;;  %v286_v56 = vld [vmem:[%s1540_s26 + $0x88] sm:$0xff]  ;;  %1431 = vrcp.f32 %v684_v39  ;;  %v686_v58 = vadd.f32 1e-06, %v662_v40  ;;  %v664_v60 = vsub.f32 %v616_v45, %v1686_v46  ;;  %v1708_v1 = vld [vmem:[%s1552_s6 + $0x98] sm:$0xff] }
  0x28   : > { %1333 = vmatprep.subr.bf16.mxu0 %v1479_v2  ;;  %1359 = vmatprep.subr.bf16.mxu1 %v1479_v2  ;;  %v1657_v22 = vpop.eup %1413  ;;  %v842_v23 = vmul.f32 %v1648_v14, %v1648_v14  ;;  %v285_v55 = vld [vmem:[%s1540_s26 + $0x80] sm:$0xff]  ;;  %1433 = vrcp.f32 %v683_v43  ;;  %v685_v62 = vadd.f32 1e-06, %v661_v44  ;;  %v663_v63 = vsub.f32 %v615_v50, %v1694_v51  ;;  %v617_v7 = vld [vmem:[%s1546_s29 + $0x90] sm:$0xff]  ;;  %v288_v17 = vld [vmem:[%s1540_s26 + $0x98] sm:$0xff] }
  0x29   : > { %875 = vperm.xlu1 %1406, %v841_v10   ;;  %v1666_v28 = vpop.eup %1415  ;;  %865 = vperm.xlu0 %1405, %v839_v15   ;;  %v840_v30 = vmul.f32 %v1657_v22, %v1657_v22  ;;  %v1716_v10 = vld [vmem:[%s1552_s6 + $0x90] sm:$0xff]  ;;  %v1343_v15 = vpack.c.bf16 %v286_v56, %v285_v55  ;;  %1435 = vrcp.f32 %v686_v58  ;;  %v688_v18 = vadd.f32 1e-06, %v664_v60  ;;  %v620_v26 = vld [vmem:[%s1546_s29 + $0xa8] sm:$0xff]  ;;  %v619_v36 = vld [vmem:[%s1546_s29 + $0xa0] sm:$0xff] }
  0x2a   : > { %v1674_v33 = vpop.eup %1417  ;;  %v844_v41 = vmul.f32 %v1666_v28, %v1666_v28  ;;  %v287_v16 = vld [vmem:[%s1540_s26 + $0x90] sm:$0xff]  ;;  %v666_v20 = vsub.f32 %v618_v0, %v1708_v1  ;;  %1437 = vrcp.f32 %v685_v62  ;;  %v687_v24 = vadd.f32 1e-06, %v663_v63  ;;  %v1738_v37 = vld [vmem:[%s1552_s6 + $0xa0] sm:$0xff]  ;;  %v290_v43 = vld [vmem:[%s1540_s26 + $0xa8] sm:$0xff] }
  0x2b   : > { %1335 = vmatpush1.bf16.msra.mxu0 %v1334_v12  ;;  %1371 = vmatpush1.bf16.msra.mxu1 %v1334_v12  ;;  %v1688_v47 = vpop.eup %1419  ;;  %v843_v49 = vmul.f32 %v1674_v33, %v1674_v33  ;;  %v665_v25 = vsub.f32 %v617_v7, %v1716_v10  ;;  %v1346_v40 = vpack.c.bf16 %v288_v17, %v287_v16  ;;  %1439 = vrcp.f32 %v688_v18  ;;  %v622_v55 = vld [vmem:[%s1546_s29 + $0xb8] sm:$0xff]  ;;  %v1760_v62 = vld [vmem:[%s1552_s6 + $0xb0] sm:$0xff] }
  0x2c   : > { %1336 = vmatprep.subr.bf16.mxu0 %v1479_v2  ;;  %1360 = vmatprep.subr.bf16.mxu1 %v1479_v2  ;;  %v1696_v52 = vpop.eup %1421  ;;  %v846_v61 = vmul.f32 %v1688_v47, %v1688_v47  ;;  %v690_v44 = vadd.f32 1e-06, %v666_v20  ;;  %1441 = vrcp.f32 %v687_v24  ;;  %v1752_v56 = vld [vmem:[%s1552_s6 + $0xb8] sm:$0xff] }
  0x2d   : > { %880 = vperm.xlu1 %1406, %v842_v23   ;;  %870 = vperm.xlu0 %1405, %v840_v30   ;;  %v1710_v3 = vpop.eup %1423  ;;  %v845_v4 = vmul.f32 %v1696_v52, %v1696_v52  ;;  %v1730_v30 = vld [vmem:[%s1552_s6 + $0xa8] sm:$0xff]  ;;  %v689_v50 = vadd.f32 1e-06, %v665_v25  ;;  %v292_v7 = vld [vmem:[%s1540_s26 + $0xb8] sm:$0xff]  ;;  %v670_v16 = vsub.f32 %v622_v55, %v1752_v56 }
  0x2e   : > { %v1718_v12 = vpop.eup %1425  ;;  %v848_v23 = vmul.f32 %v1710_v3, %v1710_v3  ;;  %v668_v45 = vsub.f32 %v620_v26, %v1730_v30  ;;  %1443 = vrcp.f32 %v690_v44 }
  0x2f   : > { %1338 = vmatpush1.bf16.msra.mxu0 %v1337_v34  ;;  %1372 = vmatpush1.bf16.msra.mxu1 %v1337_v34  ;;  %v1732_v31 = vpop.eup %1427  ;;  %v847_v34 = vmul.f32 %v1718_v12, %v1718_v12  ;;  %1445 = vrcp.f32 %v689_v50 }
  0x30   : > { %1339 = vmatprep.subr.bf16.mxu0 %v1479_v2  ;;  %1361 = vmatprep.subr.bf16.mxu1 %v1479_v2  ;;  %v1740_v39 = vpop.eup %1429 }
  0x31   : > { %890 = vperm.xlu1 %1406, %v844_v41   ;;  %885 = vperm.xlu0 %1405, %v843_v49   ;;  %v289_v41 = vld [vmem:[%s1540_s26 + $0xa0] sm:$0xff]  ;;  %v850_v49 = vmul.f32 %v1732_v31, %v1732_v31  ;;  %v1754_v58 = vpop.eup %1431  ;;  %v849_v60 = vmul.f32 %v1740_v39, %v1740_v39 }
  0x32   : > { %v1762_v63 = vpop.eup %1433  ;;  %v1349_v0 = vpack.c.bf16 %v290_v43, %v289_v41  ;;  %v852_v17 = vmul.f32 %v1754_v58, %v1754_v58 }
  0x33   : > { %1341 = vmatpush1.bf16.msra.mxu0 %v1340_v54  ;;  %1373 = vmatpush1.bf16.msra.mxu1 %v1340_v54  ;;  %v667_v54 = vsub.f32 %v619_v36, %v1738_v37  ;;  %v851_v24 = vmul.f32 %v1762_v63, %v1762_v63 }
  0x34   : > { %1342 = vmatprep.subr.bf16.mxu0 %v1479_v2  ;;  %1362 = vmatprep.subr.bf16.mxu1 %v1479_v2 }
  0x35   : > { %900 = vperm.xlu1 %1406, %v846_v61   ;;  %895 = vperm.xlu0 %1405, %v845_v4   ;;  %v621_v61 = vld [vmem:[%s1546_s29 + $0xb0] sm:$0xff]  ;;  %v691_v18 = vadd.f32 1e-06, %v667_v54  ;;  %v320_v54 = vld [vmem:[%s2208_s1 + $0xd8] sm:$0xff] }
  0x36   : > { %v291_v4 = vld [vmem:[%s1540_s26 + $0xb0] sm:$0xff]  ;;  %v669_v20 = vsub.f32 %v621_v61, %v1760_v62 }
  0x37   : > { %1344 = vmatpush1.bf16.msra.mxu0 %v1343_v15  ;;  %1374 = vmatpush1.bf16.msra.mxu1 %v1343_v15  ;;  %v692_v15 = vadd.f32 1e-06, %v668_v45  ;;  %v1352_v26 = vpack.c.bf16 %v292_v7, %v291_v4  ;;  %v317_v45 = vld [vmem:[%s2208_s1 + $0xc0] sm:$0xff]  ;;  %v319_v4 = vld [vmem:[%s2208_s1 + $0xd0] sm:$0xff]  ;;  %v298_v7 = vld [vmem:[%s2208_s1 + $0x28] sm:$0xff] }
  0x38   : > { %1345 = vmatprep.subr.bf16.mxu0 %v1479_v2  ;;  %1363 = vmatprep.subr.bf16.mxu1 %v1479_v2 }
  0x39   : > { %910 = vperm.xlu1 %1406, %v848_v23   ;;  %905 = vperm.xlu0 %1405, %v847_v34   ;;  %v1772_v23 = vpop.eup %1435  ;;  %1447 = vrcp.f32 %v692_v15  ;;  %v694_v34 = vadd.f32 1e-06, %v670_v16  ;;  %v322_v16 = vld [vmem:[%s2208_s1 + $0xe8] sm:$0xff] }
  0x3a   : > { %v1776_v25 = vpop.eup %1437  ;;  %v854_v36 = vmul.f32 %v1772_v23, %v1772_v23  ;;  %1449 = vrcp.f32 %v691_v18 }
  0x3b   : > { %1347 = vmatpush1.bf16.msra.mxu0 %v1346_v40  ;;  %1375 = vmatpush1.bf16.msra.mxu1 %v1346_v40  ;;  %v693_v40 = vadd.f32 1e-06, %v669_v20  ;;  %v1782_v41 = vpop.eup %1439  ;;  %v853_v43 = vmul.f32 %v1776_v25, %v1776_v25  ;;  %1451 = vrcp.f32 %v694_v34  ;;  %v297_v34 = vld [vmem:[%s2208_s1 + $0x20] sm:$0xff] }
  0x3c   : > { %1348 = vmatprep.subr.bf16.mxu0 %v1479_v2  ;;  %1364 = vmatprep.subr.bf16.mxu1 %v1479_v2  ;;  %v1786_v44 = vpop.eup %1441  ;;  %v856_v50 = vmul.f32 %v1782_v41, %v1782_v41 }
  0x3d   : > { %920 = vperm.xlu1 %1406, %v850_v49   ;;  %915 = vperm.xlu0 %1405, %v849_v60   ;;  %v296_v49 = vld [vmem:[%s2208_s1 + $0x18] sm:$0xff]  ;;  %1453 = vrcp.f32 %v693_v40  ;;  %v1802_v55 = vpop.eup %1443  ;;  %v855_v60 = vmul.f32 %v1786_v44, %v1786_v44 }
  0x3e   : > { %v1806_v61 = vpop.eup %1445  ;;  %v858_v15 = vmul.f32 %v1802_v55, %v1802_v55  ;;  %v300_v40 = vld [vmem:[%s2208_s1 + $0x38] sm:$0xff] }
  0x3f   : > { %1350 = vmatpush1.bf16.msra.mxu0 %v1349_v0  ;;  %1376 = vmatpush1.bf16.msra.mxu1 %v1349_v0  ;;  %v295_v0 = vld [vmem:[%s2208_s1 + $0x10] sm:$0xff]  ;;  %v857_v20 = vmul.f32 %v1806_v61, %v1806_v61 }
  0x40   : > { %1351 = vmatprep.subr.bf16.mxu0 %v1479_v2  ;;  %1365 = vmatprep.subr.bf16.mxu1 %v1479_v2  ;;  %v293_v2 = vld [vmem:[%s2208_s1] sm:$0xff] }
  0x41   : > { %930 = vperm.xlu1 %1406, %v852_v17   ;;  %925 = vperm.xlu0 %1405, %v851_v24   ;;  %v744_v17 = vsub.f32 0.0, %v1578_v21  ;;  %v743_v24 = vsub.f32 0.0, %v1564_v13 }
  0x43   : > { %1353 = vmatpush1.bf16.msra.mxu0 %v1352_v26  ;;  %1377 = vmatpush1.bf16.msra.mxu1 %v1352_v26  ;;  %v1825_v18 = vpop.eup %1447 }
  0x44   : > { %v1830_v26 = vpop.eup %1449 }
  0x45   : > { %940 = vperm.xlu1 %1406, %v854_v36   ;;  %935 = vperm.xlu0 %1405, %v853_v43   ;;  %v321_v36 = vld [vmem:[%s2208_s1 + $0xe0] sm:$0xff]  ;;  %v860_v43 = vmul.f32 %v1825_v18, %v1825_v18 }
  0x46   : > { %479 = vmatmul.mubr.f32.vlgmr.msra.gmra.mrb[0].mxu0 %v293_v2  ;;  %539 = vmatmul.mubr.f32.vlgmr.msra.gmra.mrb[0].mxu1 %v317_v45  ;;  %v324_v2 = vld [vmem:[%s2208_s1 + $0xf8] sm:$0xff]  ;;  %v768_v45 = vmul.f32 %v1657_v22, %v744_v17 }
  0x47   : > { %1293 = vmatprep.mubr.msk.f32.mxu0 %vm341_vm0, %v296_v49  ;;  %1305 = vmatprep.mubr.msk.f32.mxu1 %vm341_vm0, %v320_v54  ;;  %v746_v49 = vsub.f32 0.0, %v1574_v19  ;;  %v859_v54 = vmul.f32 %v1830_v26, %v1830_v26 }
  0x49   : > { %950 = vperm.xlu1 %1406, %v856_v50   ;;  %945 = vperm.xlu0 %1405, %v855_v60   ;;  %v1850_v50 = vpop.eup %1451  ;;  %v767_v60 = vmul.f32 %v1644_v9, %v743_v24  ;;  %v792_v24 = vsub.f32 %v768_v45, %v1578_v21  ;;  %v301_v21 = vld [vmem:[%s2208_s1 + $0x40] sm:$0xff] }
  0x4a   : > { %484 = vmatmul.mubr.f32.gmra.mrb[2].mxu0 %v295_v0  ;;  %544 = vmatmul.mubr.f32.gmra.mrb[2].mxu1 %v319_v4  ;;  %2214 = vst [vmem:[#allocation2_spill] sm:$0xff] %v1850_v50  ;;  %v745_v0 = vsub.f32 0.0, %v1560_v11  ;;  %v1856_v4 = vpop.eup %1453  ;;  %v862_v17 = vmul.f32 %v1850_v50, %v1850_v50  ;;  %v747_v50 = vsub.f32 0.0, %v1593_v35  ;;  %v325_v45 = vld [vmem:[%s2208_s1 + $0x100] sm:$0xff] }
  0x4b   : > { %1294 = vmatprep.mubr.msk.f32.mxu0 %vm341_vm0, %v298_v7  ;;  %1306 = vmatprep.mubr.msk.f32.mxu1 %vm341_vm0, %v322_v16  ;;  %v299_v7 = vld [vmem:[%s2208_s1 + $0x30] sm:$0xff]  ;;  %v302_v16 = vld [vmem:[%s2208_s1 + $0x48] sm:$0xff] }
  0x4d   : > { %960 = vperm.xlu1 %1406, %v858_v15   ;;  %955 = vperm.xlu0 %1405, %v857_v20   ;;  %v323_v15 = vld [vmem:[%s2208_s1 + $0xf0] sm:$0xff]  ;;  %v326_v20 = vld [vmem:[%s2208_s1 + $0x108] sm:$0xff] }
  0x4e   : > { %489 = vmatmul.mubr.f32.gmra.mrb[4].mxu0 %v297_v34  ;;  %549 = vmatmul.mubr.f32.gmra.mrb[4].mxu1 %v321_v36  ;;  %v770_v34 = vmul.f32 %v1648_v14, %v746_v49  ;;  %v748_v36 = vsub.f32 0.0, %v1585_v29  ;;  %v816_v49 = vmul.f32 %v1657_v22, %v792_v24  ;;  %v749_v22 = vsub.f32 0.0, %v1603_v42 }
  0x4f   : > { %1295 = vmatprep.mubr.msk.f32.mxu0 %vm341_vm0, %v300_v40  ;;  %1307 = vmatprep.mubr.msk.f32.mxu1 %vm341_vm0, %v324_v2  ;;  %v861_v40 = vmul.f32 %v1856_v4, %v1856_v4  ;;  %v769_v2 = vmul.f32 %v1638_v6, %v745_v0 }
  0x50   : > { %v772_v0 = vmul.f32 %v1666_v28, %v748_v36  ;;  %v752_v36 = vsub.f32 0.0, %v1609_v48 }
  0x51   : > { %970 = vperm.xlu1 %1406, %v860_v43   ;;  %965 = vperm.xlu0 %1405, %v859_v54   ;;  %v791_v43 = vsub.f32 %v767_v60, %v1564_v13  ;;  %v304_v13 = vld [vmem:[%s2208_s1 + $0x58] sm:$0xff]  ;;  %v794_v60 = vsub.f32 %v770_v34, %v1574_v19  ;;  %v303_v19 = vld [vmem:[%s2208_s1 + $0x50] sm:$0xff] }
  0x52   : > { %494 = vmatmul.mubr.f32.gmra.mrb[6].mxu0 %v299_v7  ;;  %554 = vmatmul.mubr.f32.gmra.mrb[6].mxu1 %v323_v15  ;;  %v328_v54 = vld [vmem:[%s2208_s1 + $0x118] sm:$0xff]  ;;  %v750_v7 = vsub.f32 0.0, %v1598_v38  ;;  %v796_v24 = vsub.f32 %v772_v0, %v1585_v29  ;;  %v305_v29 = vld [vmem:[%s2208_s1 + $0x60] sm:$0xff] }
  0x53   : > { %1296 = vmatprep.mubr.msk.f32.mxu0 %vm341_vm0, %v302_v16  ;;  %1308 = vmatprep.mubr.msk.f32.mxu1 %vm341_vm0, %v326_v20  ;;  %v815_v15 = vmul.f32 %v1644_v9, %v791_v43  ;;  %v793_v16 = vsub.f32 %v769_v2, %v1560_v11  ;;  %v327_v9 = vld [vmem:[%s2208_s1 + $0x110] sm:$0xff]  ;;  %v306_v11 = vld [vmem:[%s2208_s1 + $0x68] sm:$0xff]  ;;  %v773_v2 = vmul.f32 %v1696_v52, %v749_v22 }
  0x54   : > { %v330_v20 = vld [vmem:[%s2208_s1 + $0x128] sm:$0xff]  ;;  %v774_v34 = vmul.f32 %v1688_v47, %v750_v7 }
  0x55   : > { %980 = vperm.xlu1 %1406, %v862_v17   ;;  %975 = vperm.xlu0 %1405, %v861_v40   ;;  %v771_v17 = vmul.f32 %v1674_v33, %v747_v50  ;;  %v818_v50 = vmul.f32 %v1648_v14, %v794_v60  ;;  %v817_v40 = vmul.f32 %v1638_v6, %v793_v16  ;;  %v751_v14 = vsub.f32 0.0, %v1617_v53  ;;  %v329_v6 = vld [vmem:[%s2208_s1 + $0x120] sm:$0xff]  ;;  %v334_v16 = vld [vmem:[%s2208_s1 + $0x148] sm:$0xff] }
  0x56   : > { %499 = vmatmul.mubr.f32.gmra.mrb[8].mxu0 %v301_v21  ;;  %559 = vmatmul.mubr.f32.gmra.mrb[8].mxu1 %v325_v45  ;;  %v820_v21 = vmul.f32 %v1666_v28, %v796_v24  ;;  %v332_v45 = vld [vmem:[%s2208_s1 + $0x138] sm:$0xff]  ;;  %v797_v0 = vsub.f32 %v773_v2, %v1603_v42  ;;  %v753_v28 = vsub.f32 0.0, %v1626_v59  ;;  %v310_v42 = vld [vmem:[%s2208_s1 + $0x88] sm:$0xff] }
  0x57   : > { %1297 = vmatprep.mubr.msk.f32.mxu0 %vm341_vm0, %v304_v13  ;;  %1309 = vmatprep.mubr.msk.f32.mxu1 %vm341_vm0, %v328_v54  ;;  %v795_v43 = vsub.f32 %v771_v17, %v1593_v35  ;;  %v308_v35 = vld [vmem:[%s2208_s1 + $0x78] sm:$0xff]  ;;  %v798_v13 = vsub.f32 %v774_v34, %v1598_v38  ;;  %v754_v54 = vsub.f32 0.0, %v1622_v57  ;;  %v775_v7 = vmul.f32 %v1718_v12, %v751_v14  ;;  %v307_v38 = vld [vmem:[%s2208_s1 + $0x70] sm:$0xff] }
  0x58   : > { %v336_v24 = vld [vmem:[%s2208_s1 + $0x158] sm:$0xff] }
  0x59   : > { %1014 = vperm.xlu1 %1406, %v816_v49   ;;  %1009 = vperm.xlu0 %1405, %v815_v15   ;;  %v776_v49 = vmul.f32 %v1710_v3, %v752_v36  ;;  %v819_v60 = vmul.f32 %v1674_v33, %v795_v43  ;;  %v331_v33 = vld [vmem:[%s2208_s1 + $0x130] sm:$0xff]  ;;  %v822_v15 = vmul.f32 %v1688_v47, %v798_v13  ;;  %v755_v47 = vsub.f32 0.0, %v1642_v8 }
  0x5a   : > { %504 = vmatmul.mubr.f32.gmra.mrb[10].mxu0 %v303_v19  ;;  %564 = vmatmul.mubr.f32.gmra.mrb[10].mxu1 %v327_v9  ;;  %v778_v22 = vmul.f32 %v1732_v31, %v754_v54  ;;  %v756_v19 = vsub.f32 0.0, %v1636_v5  ;;  %v821_v9 = vmul.f32 %v1696_v52, %v797_v0  ;;  %v333_v52 = vld [vmem:[%s2208_s1 + $0x140] sm:$0xff]  ;;  %v340_v0 = vld [vmem:[%s2208_s1 + $0x178] sm:$0xff] }
  0x5b   : > { %1298 = vmatprep.mubr.msk.f32.mxu0 %vm341_vm0, %v306_v11  ;;  %1310 = vmatprep.mubr.msk.f32.mxu1 %vm341_vm0, %v330_v20  ;;  %v800_v17 = vsub.f32 %v776_v49, %v1609_v48  ;;  %v799_v11 = vsub.f32 %v775_v7, %v1617_v53  ;;  %v309_v48 = vld [vmem:[%s2208_s1 + $0x80] sm:$0xff]  ;;  %v312_v53 = vld [vmem:[%s2208_s1 + $0x98] sm:$0xff]  ;;  %v779_v14 = vmul.f32 %v1762_v63, %v755_v47 }
  0x5c   : > { %v802_v34 = vsub.f32 %v778_v22, %v1622_v57  ;;  %v780_v36 = vmul.f32 %v1754_v58, %v756_v19  ;;  %v311_v57 = vld [vmem:[%s2208_s1 + $0x90] sm:$0xff]  ;;  %v764_v22 = vsub.f32 0.0, %v1730_v30 }
  0x5d   : > { %1024 = vperm.xlu1 %1406, %v818_v50   ;;  %1019 = vperm.xlu0 %1405, %v817_v40   ;;  %v777_v50 = vmul.f32 %v1740_v39, %v753_v28  ;;  %v824_v20 = vmul.f32 %v1710_v3, %v800_v17  ;;  %v758_v40 = vsub.f32 0.0, %v1664_v27  ;;  %v823_v43 = vmul.f32 %v1718_v12, %v799_v11  ;;  %v335_v12 = vld [vmem:[%s2208_s1 + $0x150] sm:$0xff] }
  0x5e   : > { %509 = vmatmul.mubr.f32.gmra.mrb[12].mxu0 %v305_v29  ;;  %569 = vmatmul.mubr.f32.gmra.mrb[12].mxu1 %v329_v6  ;;  %v757_v3 = vsub.f32 0.0, %v1672_v32  ;;  %v826_v29 = vmul.f32 %v1732_v31, %v802_v34  ;;  %v338_v6 = vld [vmem:[%s2208_s1 + $0x168] sm:$0xff]  ;;  %v803_v49 = vsub.f32 %v779_v14, %v1642_v8  ;;  %v759_v31 = vsub.f32 0.0, %v1694_v51  ;;  %v316_v8 = vld [vmem:[%s2208_s1 + $0xb8] sm:$0xff] }
  0x5f   : > { %1299 = vmatprep.mubr.msk.f32.mxu0 %vm341_vm0, %v308_v35  ;;  %1311 = vmatprep.mubr.msk.f32.mxu1 %vm341_vm0, %v332_v45  ;;  %v801_v2 = vsub.f32 %v777_v50, %v1626_v59  ;;  %v314_v59 = vld [vmem:[%s2208_s1 + $0xa8] sm:$0xff]  ;;  %v804_v35 = vsub.f32 %v780_v36, %v1636_v5  ;;  %v760_v45 = vsub.f32 0.0, %v1686_v46  ;;  %v313_v5 = vld [vmem:[%s2208_s1 + $0xa0] sm:$0xff]  ;;  %v763_v50 = vsub.f32 0.0, %v1738_v37 }
  0x60   : > { %v781_v54 = vmul.f32 %v1776_v25, %v757_v3  ;;  %v788_v47 = vmul.f32 %v1825_v18, %v764_v22 }
  0x61   : > { %1034 = vperm.xlu1 %1406, %v820_v21   ;;  %1029 = vperm.xlu0 %1405, %v819_v60   ;;  %v782_v21 = vmul.f32 %v1772_v23, %v758_v40  ;;  %v825_v13 = vmul.f32 %v1740_v39, %v801_v2  ;;  %v337_v39 = vld [vmem:[%s2208_s1 + $0x160] sm:$0xff]  ;;  %v828_v60 = vmul.f32 %v1754_v58, %v804_v35  ;;  %v761_v58 = vsub.f32 0.0, %v1716_v10 }
  0x62   : > { %514 = vmatmul.mubr.f32.gmra.mrb[14].mxu0 %v307_v38  ;;  %574 = vmatmul.mubr.f32.gmra.mrb[14].mxu1 %v331_v33  ;;  %v784_v28 = vmul.f32 %v1782_v41, %v760_v45  ;;  %v762_v38 = vsub.f32 0.0, %v1708_v1  ;;  %v827_v33 = vmul.f32 %v1762_v63, %v803_v49  ;;  %v339_v63 = vld [vmem:[%s2208_s1 + $0x170] sm:$0xff] }
  0x63   : > { %1300 = vmatprep.mubr.msk.f32.mxu0 %vm341_vm0, %v310_v42  ;;  %1312 = vmatprep.mubr.msk.f32.mxu1 %vm341_vm0, %v334_v16  ;;  %v806_v7 = vsub.f32 %v782_v21, %v1664_v27  ;;  %v805_v42 = vsub.f32 %v781_v54, %v1672_v32  ;;  %v315_v27 = vld [vmem:[%s2208_s1 + $0xb0] sm:$0xff]  ;;  %v785_v11 = vmul.f32 %v1806_v61, %v761_v58 }
  0x64   : > { %v808_v16 = vsub.f32 %v784_v28, %v1686_v46  ;;  %v786_v17 = vmul.f32 %v1802_v55, %v762_v38 }
  0x65   : > { %1044 = vperm.xlu1 %1406, %v822_v15   ;;  %1039 = vperm.xlu0 %1405, %v821_v9   ;;  %v783_v15 = vmul.f32 %v1786_v44, %v759_v31  ;;  %v830_v32 = vmul.f32 %v1772_v23, %v806_v7  ;;  %v829_v19 = vmul.f32 %v1776_v25, %v805_v42 }
  0x66   : > { %519 = vmatmul.mubr.f32.gmra.mrb[16].mxu0 %v309_v48  ;;  %579 = vmatmul.mubr.f32.gmra.mrb[16].mxu1 %v333_v52  ;;  %v832_v23 = vmul.f32 %v1782_v41, %v808_v16  ;;  %v810_v46 = vsub.f32 %v786_v17, %v1708_v1  ;;  %v766_v48 = vsub.f32 0.0, %v1752_v56  ;;  %v809_v52 = vsub.f32 %v785_v11, %v1716_v10 }
  0x67   : > { %1301 = vmatprep.mubr.msk.f32.mxu0 %vm341_vm0, %v312_v53  ;;  %1313 = vmatprep.mubr.msk.f32.mxu1 %vm341_vm0, %v336_v24  ;;  %v807_v9 = vsub.f32 %v783_v15, %v1694_v51  ;;  %v787_v51 = vmul.f32 %v1830_v26, %v763_v50  ;;  %v765_v53 = vsub.f32 0.0, %v1760_v62  ;;  %v812_v41 = vsub.f32 %v788_v47, %v1730_v30  ;;  %v2215_v24 = vld [vmem:[#allocation2_spill] sm:$0xff] }
  0x68   : > { %v790_v1 = vmul.f32 %v2215_v24, %v766_v48  ;;  %v833_v34 = vmul.f32 %v1806_v61, %v809_v52 }
  0x69   : > { %1054 = vperm.xlu1 %1406, %v824_v20   ;;  %1049 = vperm.xlu0 %1405, %v823_v43   ;;  %v831_v25 = vmul.f32 %v1786_v44, %v807_v9  ;;  %v834_v20 = vmul.f32 %v1802_v55, %v810_v46  ;;  %v811_v36 = vsub.f32 %v787_v51, %v1738_v37 }
  0x6a   : > { %524 = vmatmul.mubr.f32.gmra.mrb[18].mxu0 %v311_v57  ;;  %584 = vmatmul.mubr.f32.gmra.mrb[18].mxu1 %v335_v12  ;;  %v789_v44 = vmul.f32 %v1856_v4, %v765_v53  ;;  %v836_v10 = vmul.f32 %v1825_v18, %v812_v41  ;;  %v814_v40 = vsub.f32 %v790_v1, %v1752_v56 }
  0x6b   : > { %1302 = vmatprep.mubr.msk.f32.mxu0 %vm341_vm0, %v314_v59  ;;  %1314 = vmatprep.mubr.msk.f32.mxu1 %vm341_vm0, %v338_v6  ;;  %v835_v43 = vmul.f32 %v1830_v26, %v811_v36 }
  0x6c   : > { %v813_v55 = vsub.f32 %v789_v44, %v1760_v62  ;;  %v838_v30 = vmul.f32 %v2215_v24, %v814_v40 }
  0x6d   : > { %1064 = vperm.xlu1 %1406, %v826_v29   ;;  %1059 = vperm.xlu0 %1405, %v825_v13  }
  0x6e   : > { %529 = vmatmul.mubr.f32.gmra.mrb[20].mxu0 %v313_v5  ;;  %589 = vmatmul.mubr.f32.gmra.mrb[20].mxu1 %v337_v39  ;;  %v837_v61 = vmul.f32 %v1856_v4, %v813_v55 }
  0x6f   : > { %1303 = vmatprep.mubr.msk.f32.mxu0 %vm341_vm0, %v316_v8  ;;  %1315 = vmatprep.mubr.msk.f32.mxu1 %vm341_vm0, %v340_v0 }
  0x71   : > { %1074 = vperm.xlu1 %1406, %v828_v60   ;;  %1069 = vperm.xlu0 %1405, %v827_v33  }
  0x72   : > { %534 = vmatmul.mubr.f32.gmra.mrb[22].mxu0 %v315_v27  ;;  %594 = vmatmul.mubr.f32.gmra.mrb[22].mxu1 %v339_v63 }
  0x75   : > { %1084 = vperm.xlu1 %1406, %v830_v32   ;;  %1079 = vperm.xlu0 %1405, %v829_v19  }
  0x79   : > { %1094 = vperm.xlu1 %1406, %v832_v23   ;;  %1089 = vperm.xlu0 %1405, %v831_v25  }
  0x7d   : > { %1104 = vperm.xlu1 %1406, %v834_v20   ;;  %1099 = vperm.xlu0 %1405, %v833_v34  }
  0x81   : > { %1114 = vperm.xlu1 %1406, %v836_v10   ;;  %1109 = vperm.xlu0 %1405, %v835_v43  }
  0x85   : > { %1124 = vperm.xlu1 %1406, %v838_v30   ;;  %1119 = vperm.xlu0 %1405, %v837_v61  }
  0xa8   : > { %v866_v37 = vpop.permute.xlu0 %865  ;;  %v876_v2 = vpop.permute.xlu1 %875 }
  0xac   : > { %v871_v14 = vpop.permute.xlu0 %870  ;;  %v2072_v3 = vpop.permute.xlu1 %880 }
  0xb0   : > { %v2074_v18 = vpop.permute.xlu0 %885  ;;  %v2076_v56 = vpop.permute.xlu1 %890 }
  0xb4   : > { %v2078_v26 = vpop.permute.xlu0 %895  ;;  %v2080_v62 = vpop.permute.xlu1 %900 }
  0xb8   : > { %v2082_v57 = vpop.permute.xlu0 %905  ;;  %v2084_v12 = vpop.permute.xlu1 %910 }
  0xbc   : > { %v2086_v4 = vpop.permute.xlu0 %915  ;;  %v2088_v59 = vpop.permute.xlu1 %920 }
  0xc0   : > { %v926_v29 = vpop.permute.xlu0 %925  ;;  %v931_v6 = vpop.permute.xlu1 %930 }
  0xc4   : > { %v936_v35 = vpop.permute.xlu0 %935  ;;  %v941_v21 = vpop.permute.xlu1 %940 }
  0xc8   : > { %v2090_v45 = vpop.permute.xlu0 %945  ;;  %v2092_v13 = vpop.permute.xlu1 %950 }
  0xcc   : > { %v2094_v49 = vpop.permute.xlu0 %955  ;;  %v2096_v54 = vpop.permute.xlu1 %960 }
  0xd0   : > { %v2098_v31 = vpop.permute.xlu0 %965  ;;  %v2100_v5 = vpop.permute.xlu1 %970 }
  0xd4   : > { %v2102_v39 = vpop.permute.xlu0 %975  ;;  %v2104_v8 = vpop.permute.xlu1 %980 }
  0xd8   : > { %v1010_v60 = vpop.permute.xlu0 %1009  ;;  %v1015_v0 = vpop.permute.xlu1 %1014 }
  0xdc   : > { %v1020_v7 = vpop.permute.xlu0 %1019  ;;  %v1025_v28 = vpop.permute.xlu1 %1024 }
  0xe0   : > { %v1030_v38 = vpop.permute.xlu0 %1029  ;;  %v2106_v33 = vpop.permute.xlu1 %1034 }
  0xe4   : > { %v2108_v42 = vpop.permute.xlu0 %1039  ;;  %v2110_v15 = vpop.permute.xlu1 %1044 }
  0xe8   : > { %v2112_v58 = vpop.permute.xlu0 %1049  ;;  %v2114_v27 = vpop.permute.xlu1 %1054 }
  0xec   : > { %v2116_v63 = vpop.permute.xlu0 %1059  ;;  %v2118_v32 = vpop.permute.xlu1 %1064 }
  0xf0   : > { %v1070_v50 = vpop.permute.xlu0 %1069  ;;  %v1075_v20 = vpop.permute.xlu1 %1074 }
  0xf4   : > { %v1080_v43 = vpop.permute.xlu0 %1079 }
 0x119   : > { %v480_v16 = vpop.f32.mrb[0].mxu0  ;;  %v540_v22 = vpop.f32.mrb[0].mxu1 }
 0x11a   : > { %v983_v17 = vmul.f32 %v866_v37, %v480_v16  ;;  %v482_v19 = vpop.f32.mrb[1].mxu0  ;;  %v995_v9 = vmul.f32 %v926_v29, %v540_v22  ;;  %v542_v11 = vpop.f32.mrb[1].mxu1 }
 0x11c   : > { %v1127_v23 = vadd.f32 %v1010_v60, %v983_v17  ;;  %v1139_v46 = vadd.f32 %v1070_v50, %v995_v9  ;;  %v1085_v60 = vpop.permute.xlu1 %1084 }
 0x11d   : > { %v485_v47 = vpop.f32.mrb[2].mxu0  ;;  %v545_v25 = vpop.f32.mrb[2].mxu1 }
 0x11e   : > { %1152 = vst.msk [vmem:[%s2124_s13] sm:$0xff] %vm1151_vm1, %v1127_v23  ;;  %v984_v48 = vmul.f32 %v871_v14, %v485_v47  ;;  %v487_v52 = vpop.f32.mrb[3].mxu0  ;;  %1164 = vst.msk [vmem:[%s2124_s13 + $0x60] sm:$0xff] %vm1151_vm1, %v1139_v46  ;;  %v996_v51 = vmul.f32 %v931_v6, %v545_v25  ;;  %v547_v53 = vpop.f32.mrb[3].mxu1 }
 0x120   : > { %v1128_v41 = vadd.f32 %v1015_v0, %v984_v48  ;;  %v1140_v24 = vadd.f32 %v1075_v20, %v996_v51 }
 0x121   : > { %v490_v1 = vpop.f32.mrb[4].mxu0  ;;  %v550_v36 = vpop.f32.mrb[4].mxu1 }
 0x122   : > { %1153 = vst.msk [vmem:[%s2124_s13 + $0x8] sm:$0xff] %vm1151_vm1, %v1128_v41  ;;  %v985_v34 = vmul.f32 %v876_v2, %v490_v1  ;;  %v492_v44 = vpop.f32.mrb[5].mxu0  ;;  %1165 = vst.msk [vmem:[%s2124_s13 + $0x68] sm:$0xff] %vm1151_vm1, %v1140_v24  ;;  %v997_v10 = vmul.f32 %v936_v35, %v550_v36  ;;  %v552_v40 = vpop.f32.mrb[5].mxu1 }
 0x124   : > { %v1129_v55 = vadd.f32 %v1020_v7, %v985_v34  ;;  %v1141_v30 = vadd.f32 %v1080_v43, %v997_v10 }
 0x125   : > { %v495_v61 = vpop.f32.mrb[6].mxu0  ;;  %v555_v14 = vpop.f32.mrb[6].mxu1 }
 0x126   : > { %1154 = vst.msk [vmem:[%s2124_s13 + $0x10] sm:$0xff] %vm1151_vm1, %v1129_v55  ;;  %v986_v37 = vmul.f32 %v2072_v3, %v495_v61  ;;  %v497_v29 = vpop.f32.mrb[7].mxu0  ;;  %1166 = vst.msk [vmem:[%s2124_s13 + $0x70] sm:$0xff] %vm1151_vm1, %v1141_v30  ;;  %v998_v2 = vmul.f32 %v941_v21, %v555_v14  ;;  %v557_v6 = vpop.f32.mrb[7].mxu1 }
 0x127   : > { %v1090_v21 = vpop.permute.xlu0 %1089 }
 0x128   : > { %v1130_v35 = vadd.f32 %v1025_v28, %v986_v37  ;;  %v1142_v0 = vadd.f32 %v1085_v60, %v998_v2 }
 0x129   : > { %v500_v16 = vpop.f32.mrb[8].mxu0  ;;  %v560_v17 = vpop.f32.mrb[8].mxu1 }
 0x12a   : > { %1155 = vst.msk [vmem:[%s2124_s13 + $0x18] sm:$0xff] %vm1151_vm1, %v1130_v35  ;;  %v987_v7 = vmul.f32 %v2074_v18, %v500_v16  ;;  %v502_v22 = vpop.f32.mrb[9].mxu0  ;;  %1167 = vst.msk [vmem:[%s2124_s13 + $0x78] sm:$0xff] %vm1151_vm1, %v1142_v0  ;;  %v999_v3 = vmul.f32 %v2090_v45, %v560_v17  ;;  %v562_v19 = vpop.f32.mrb[9].mxu1 }
 0x12b   : > { %v1095_v45 = vpop.permute.xlu1 %1094 }
 0x12c   : > { %v1131_v9 = vadd.f32 %v1030_v38, %v987_v7  ;;  %v1143_v11 = vadd.f32 %v1090_v21, %v999_v3 }
 0x12d   : > { %v505_v50 = vpop.f32.mrb[10].mxu0  ;;  %v565_v23 = vpop.f32.mrb[10].mxu1 }
 0x12e   : > { %1156 = vst.msk [vmem:[%s2124_s13 + $0x20] sm:$0xff] %vm1151_vm1, %v1131_v9  ;;  %v988_v28 = vmul.f32 %v2076_v56, %v505_v50  ;;  %v507_v46 = vpop.f32.mrb[11].mxu0  ;;  %1168 = vst.msk [vmem:[%s2124_s13 + $0x80] sm:$0xff] %vm1151_vm1, %v1143_v11  ;;  %v1000_v18 = vmul.f32 %v2092_v13, %v565_v23  ;;  %v567_v47 = vpop.f32.mrb[11].mxu1 }
 0x12f   : > { %v1100_v13 = vpop.permute.xlu0 %1099 }
 0x130   : > { %v1132_v48 = vadd.f32 %v2106_v33, %v988_v28  ;;  %v1144_v25 = vadd.f32 %v1095_v45, %v1000_v18 }
 0x131   : > { %v510_v38 = vpop.f32.mrb[12].mxu0  ;;  %v570_v51 = vpop.f32.mrb[12].mxu1 }
 0x132   : > { %1157 = vst.msk [vmem:[%s2124_s13 + $0x28] sm:$0xff] %vm1151_vm1, %v1132_v48  ;;  %v989_v52 = vmul.f32 %v2078_v26, %v510_v38  ;;  %v512_v56 = vpop.f32.mrb[13].mxu0  ;;  %1169 = vst.msk [vmem:[%s2124_s13 + $0x88] sm:$0xff] %vm1151_vm1, %v1144_v25  ;;  %v1001_v53 = vmul.f32 %v2094_v49, %v570_v51  ;;  %v572_v20 = vpop.f32.mrb[13].mxu1 }
 0x133   : > { %v1105_v49 = vpop.permute.xlu1 %1104 }
 0x134   : > { %v1133_v41 = vadd.f32 %v2108_v42, %v989_v52  ;;  %v1145_v24 = vadd.f32 %v1100_v13, %v1001_v53 }
 0x135   : > { %v515_v33 = vpop.f32.mrb[14].mxu0  ;;  %v575_v34 = vpop.f32.mrb[14].mxu1 }
 0x136   : > { %1158 = vst.msk [vmem:[%s2124_s13 + $0x30] sm:$0xff] %vm1151_vm1, %v1133_v41  ;;  %v990_v1 = vmul.f32 %v2080_v62, %v515_v33  ;;  %v517_v26 = vpop.f32.mrb[15].mxu0  ;;  %1170 = vst.msk [vmem:[%s2124_s13 + $0x90] sm:$0xff] %vm1151_vm1, %v1145_v24  ;;  %v1002_v36 = vmul.f32 %v2096_v54, %v575_v34  ;;  %v577_v44 = vpop.f32.mrb[15].mxu1 }
 0x137   : > { %v1110_v54 = vpop.permute.xlu0 %1109 }
 0x138   : > { %v1134_v10 = vadd.f32 %v2110_v15, %v990_v1  ;;  %v1146_v40 = vadd.f32 %v1105_v49, %v1002_v36 }
 0x139   : > { %v520_v42 = vpop.f32.mrb[16].mxu0  ;;  %v580_v55 = vpop.f32.mrb[16].mxu1 }
 0x13a   : > { %1159 = vst.msk [vmem:[%s2124_s13 + $0x38] sm:$0xff] %vm1151_vm1, %v1134_v10  ;;  %v991_v43 = vmul.f32 %v2082_v57, %v520_v42  ;;  %v522_v62 = vpop.f32.mrb[17].mxu0  ;;  %1171 = vst.msk [vmem:[%s2124_s13 + $0x98] sm:$0xff] %vm1151_vm1, %v1146_v40  ;;  %v1003_v30 = vmul.f32 %v2098_v31, %v580_v55  ;;  %v582_v61 = vpop.f32.mrb[17].mxu1 }
 0x13b   : > { %v1115_v31 = vpop.permute.xlu1 %1114  ;;  %v1120_v22 = vpop.permute.xlu0 %1119 }
 0x13c   : > { %v1135_v37 = vadd.f32 %v2112_v58, %v991_v43  ;;  %v1147_v14 = vadd.f32 %v1110_v54, %v1003_v30 }
 0x13d   : > { %v525_v15 = vpop.f32.mrb[18].mxu0  ;;  %v585_v2 = vpop.f32.mrb[18].mxu1 }
 0x13e   : > { %1160 = vst.msk [vmem:[%s2124_s13 + $0x40] sm:$0xff] %vm1151_vm1, %v1135_v37  ;;  %v992_v29 = vmul.f32 %v2084_v12, %v525_v15  ;;  %v527_v57 = vpop.f32.mrb[19].mxu0  ;;  %1172 = vst.msk [vmem:[%s2124_s13 + $0xa0] sm:$0xff] %vm1151_vm1, %v1147_v14  ;;  %v1004_v6 = vmul.f32 %v2100_v5, %v585_v2  ;;  %v587_v60 = vpop.f32.mrb[19].mxu1 }
 0x140   : > { %v1136_v35 = vadd.f32 %v2114_v27, %v992_v29  ;;  %v1148_v0 = vadd.f32 %v1115_v31, %v1004_v6 }
 0x141   : > { %v530_v58 = vpop.f32.mrb[20].mxu0  ;;  %v590_v7 = vpop.f32.mrb[20].mxu1 }
 0x142   : > { %1161 = vst.msk [vmem:[%s2124_s13 + $0x48] sm:$0xff] %vm1151_vm1, %v1136_v35  ;;  %v993_v16 = vmul.f32 %v2086_v4, %v530_v58  ;;  %v532_v12 = vpop.f32.mrb[21].mxu0  ;;  %1173 = vst.msk [vmem:[%s2124_s13 + $0xa8] sm:$0xff] %vm1151_vm1, %v1148_v0  ;;  %v1005_v17 = vmul.f32 %v2102_v39, %v590_v7  ;;  %v592_v5 = vpop.f32.mrb[21].mxu1 }
 0x143   : > { %v1125_v39 = vpop.permute.xlu1 %1124 }
 0x144   : > { %v1137_v3 = vadd.f32 %v2116_v63, %v993_v16  ;;  %v1149_v27 = vadd.f32 %v1120_v22, %v1005_v17 }
 0x145   : > { %v535_v19 = vpop.f32.mrb[22].mxu0  ;;  %v595_v9 = vpop.f32.mrb[22].mxu1 }
 0x146   : > { %1162 = vst.msk [vmem:[%s2124_s13 + $0x50] sm:$0xff] %vm1151_vm1, %v1137_v3  ;;  %v994_v21 = vmul.f32 %v2088_v59, %v535_v19  ;;  %v537_v4 = vpop.f32.mrb[23].mxu0  ;;  %1174 = vst.msk [vmem:[%s2124_s13 + $0xb0] sm:$0xff] %vm1151_vm1, %v1149_v27  ;;  %v1006_v11 = vmul.f32 %v2104_v8, %v595_v9  ;;  %v597_v50 = vpop.f32.mrb[23].mxu1 }
 0x148   : > { %v1138_v28 = vadd.f32 %v2118_v32, %v994_v21  ;;  %v1150_v23 = vadd.f32 %v1125_v39, %v1006_v11 }
 0x14a   : > { %1163 = vst.msk [vmem:[%s2124_s13 + $0x58] sm:$0xff] %vm1151_vm1, %v1138_v28  ;;  %1175 = vst.msk [vmem:[%s2124_s13 + $0xb8] sm:$0xff] %vm1151_vm1, %v1150_v23 }
 0x14b PF: > { %s14_s17 = sadd.s32 1, %s1477_s17   ;;  %s2216_s15 = smov %s1473_s16 }
 0x14c   : > { %p11_p5 = scmp.ge.s32.totalorder %s14_s17, 4   ;;  %s2217_s16 = smov %s2219_s18 }
 0x14e   :  { %13 = sbr.rel (!%p11_p5) target bundleno = 2 (0x2), region = 72 }

</bundles_post_ra>
